<compile_context>
chip_gen: v5e
topology: v5e:2x2
jax: 0.10.0
libtpu: 0.0.40
codegen_flags: <defaults>
</compile_context>

<pallas_src>
import functools
import math

import jax
import jax.numpy as jnp
from jax import lax
from jax.experimental import pallas as pl
from jax.experimental.pallas import tpu as pltpu

_EPS = 0.0001
_LOG_EPS = math.log(_EPS)             # log(1e-4)
_LOG_1M_EPS = math.log(1.0 - _EPS)    # log(1 - 1e-4)


def _focal_budgets():
    """(pipeline block budget bytes, scoped-VMEM limit bytes) per TPU generation."""
    try:
        kind = jax.devices()[0].device_kind.lower()
    except Exception:
        kind = ""
    if "v5" in kind or "v6" in kind:
        # 128 MiB physical VMEM: bigger blocks amortize the ~0.35us per-step overhead.
        return 20 * 1024 * 1024, 64 * 1024 * 1024
    # Conservative for v7x (64 MiB physical VMEM per TC) and unknown chips.
    return 8 * 1024 * 1024, 32 * 1024 * 1024


def _row_block(n_rows, hw, budget):
    """Row-block size for the (n_rows, hw) focal pass (f32 logits + f32 gt,
    each double-buffered by the BlockSpec pipeline). Any size is legal because
    the kernel masks out-of-range rows; prefer >= 2 grid steps (v7x megacore)."""
    per_row_bytes = hw * (4 + 4)                       # f32 logits + f32 gt
    cap = max(1, budget // (2 * per_row_bytes))        # 2 pipeline buffers per input
    want = -(-n_rows // 2) if n_rows >= 16 else n_rows # split work across 2 TCs
    tr = min(cap, want, n_rows)
    if tr < n_rows:
        tr = max(8, (tr // 8) * 8)                     # sublane-aligned partial blocks
    return min(tr, n_rows)


# ----------------------------- Focal loss kernel ----------------------------- #
def _focal_partial_kernel(logits_ref, gt_ref, out_ref, *, n_rows, block_rows):
    # logits_ref / gt_ref: (TR, HW) f32 blocks
    # out_ref:             (2, 128) f32 partials -- row 0: sum(pos+neg), row 1: num_pos
    x = logits_ref[...]
    gt = gt_ref[...]

    # Validity mask for the (possibly partial) last row block: garbage in the
    # out-of-bounds pad region contributes exactly zero.
    row0 = pl.program_id(0) * block_rows
    rows = row0 + lax.broadcasted_iota(jnp.int32, (block_rows, 1), 0)
    valid = rows < n_rows                                   # (TR, 1)

    # sigmoid via tanh -> exactly 2 transcendentals per element (tanh + log),
    # then the reference clamp to [1e-4, 1 - 1e-4].
    pred = jnp.clip(0.5 * (1.0 + jnp.tanh(0.5 * x)), _EPS, 1.0 - _EPS)
    log_p = jnp.log(pred)                                   # single log (EUP)
    # log(1 - sigmoid(x)) == log(sigmoid(x)) - x; the clip reproduces the effect
    # of the pred clamp on the reference's log(1 - pred).
    log_1mp = jnp.clip(log_p - x, _LOG_EPS, _LOG_1M_EPS)

    one_m_pred = 1.0 - pred
    t = 1.0 - gt
    t2 = t * t
    t4 = t2 * t2                                            # (1 - gt)^4, two muls

    is_pos = gt == 1.0
    w = jnp.where(is_pos, one_m_pred * one_m_pred, pred * pred * t4)
    lg = jnp.where(is_pos, log_p, log_1mp)
    keep = valid & (gt <= 1.0)                              # gt > 1 contributes nothing
    contrib = jnp.where(keep, w * lg, 0.0)
    pos_f = jnp.where(valid & is_pos, 1.0, 0.0)

    out_ref[0, :] = jnp.broadcast_to(jnp.sum(contrib), (128,))
    out_ref[1, :] = jnp.broadcast_to(jnp.sum(pos_f), (128,))


def focal_loss_hm(logits_nchw, gt_nchw):
    B, C, H, W = logits_nchw.shape
    BC, HW = B * C, H * W
    # Logits stay f32: the bf16 pre-cast was an extra HBM pass (anti-pattern).
    logits2d = logits_nchw.reshape(BC, HW).astype(jnp.float32)
    gt2d = gt_nchw.reshape(BC, HW).astype(jnp.float32)

    budget, vmem_limit = _focal_budgets()
    tr = _row_block(BC, HW, budget)
    gr = pl.cdiv(BC, tr)

    parts = pl.pallas_call(
        functools.partial(_focal_partial_kernel, n_rows=BC, block_rows=tr),
        out_shape=jax.ShapeDtypeStruct((gr, 2, 128), jnp.float32),
        grid=(gr,),
        in_specs=[
            pl.BlockSpec((tr, HW), lambda i: (i, 0)),
            pl.BlockSpec((tr, HW), lambda i: (i, 0)),
        ],
        out_specs=pl.BlockSpec((None, 2, 128), lambda i: (i, 0, 0)),
        compiler_params=pltpu.CompilerParams(
            dimension_semantics=("parallel",),
            vmem_limit_bytes=vmem_limit),
    )(logits2d, gt2d)

    # Single combine op for both partial sums.
    sums = jnp.sum(parts[:, :, 0], axis=0)
    loss_sum, num_pos = sums[0], sums[1]
    # == -(pos_loss + neg_loss)/num_pos, and == -neg_loss when num_pos == 0
    # (when num_pos == 0 every contribution is a neg term), NaN-safe denominator.
    return -loss_sum / jnp.maximum(num_pos, 1.0)


# ----------------------- Fused masked RegL1 (wh + reg) ----------------------- #
def _regl1_pair_kernel(wh_pred_ref, wh_tgt_ref, reg_pred_ref, reg_tgt_ref,
                       mask_ref, out_ref):
    # All inputs are tiny (B, K, Cr)/(B, K, 1) f32 arrays, whole in VMEM.
    # out_ref: (8, 128) f32 -- row 0: wh L1 sum, row 1: reg L1 sum, row 2: mask sum
    m = mask_ref[...]                                        # (B, K, 1)
    wh_sum = jnp.sum(jnp.abs(wh_pred_ref[...] * m - wh_tgt_ref[...] * m))
    reg_sum = jnp.sum(jnp.abs(reg_pred_ref[...] * m - reg_tgt_ref[...] * m))
    mask_sum = jnp.sum(m)

    out_ref[...] = jnp.zeros_like(out_ref)
    out_ref[0, :] = jnp.broadcast_to(wh_sum, (128,))
    out_ref[1, :] = jnp.broadcast_to(reg_sum, (128,))
    out_ref[2, :] = jnp.broadcast_to(mask_sum, (128,))


def _gather_pred(feat_nchw, ind):
    """feat (B, Cr, H, W), ind (B, K) of flat H*W indices -> (B, K, Cr) f32.
    Gathers straight from the NCHW layout (free reshape), so only the K rows
    move; no full-map transpose/concat copies."""
    B, Cr, H, W = feat_nchw.shape
    feat = feat_nchw.reshape(B, Cr, H * W)
    g = jnp.take_along_axis(feat, ind[:, None, :], axis=2)   # (B, Cr, K)
    return jnp.transpose(g, (0, 2, 1)).astype(jnp.float32)   # tiny (B, K, Cr)


def regl1_losses(wh_feat, reg_feat, reg_mask, ind, wh_target, reg_target):
    ind = ind.astype(jnp.int32)
    wh_pred = _gather_pred(wh_feat, ind)                     # (B, K, Cwh)
    reg_pred = _gather_pred(reg_feat, ind)                   # (B, K, Creg)
    mask3 = reg_mask.astype(jnp.float32)[..., None]          # (B, K, 1)

    sums = pl.pallas_call(
        _regl1_pair_kernel,
        out_shape=jax.ShapeDtypeStruct((8, 128), jnp.float32),
    )(wh_pred, wh_target.astype(jnp.float32),
      reg_pred, reg_target.astype(jnp.float32), mask3)

    head = sums[:3, 0]                                       # one slice op
    wh_sum, reg_sum, mask_sum = head[0], head[1], head[2]
    c_wh = wh_pred.shape[-1]
    c_reg = reg_pred.shape[-1]
    # reference denominator: mask expanded to (B, K, Cr) -> sum == Cr * mask.sum()
    wh_loss = wh_sum / (c_wh * mask_sum + _EPS)
    off_loss = reg_sum / (c_reg * mask_sum + _EPS)
    return wh_loss, off_loss


# ------------------------------ CenterNetLoss -------------------------------- #
def centernet_loss(output, batch, hm_weight=1.0, wh_weight=1.0, off_weight=1.0):
    """output/batch mirror the PyTorch dicts; output['hm'] holds raw logits
    (NCHW) -- the sigmoid + clamp of the reference is fused into the focal kernel."""
    hm_loss = focal_loss_hm(output["hm"], batch["hm"])
    wh_loss, off_loss = regl1_losses(output["wh"], output["reg"],
                                     batch["reg_mask"], batch["ind"],
                                     batch["wh"], batch["reg"])

    loss = hm_weight * hm_loss + wh_weight * wh_loss + off_weight * off_loss
    loss_stats = {"loss": loss, "hm_loss": hm_loss,
                  "wh_loss": wh_loss, "off_loss": off_loss}
    return loss, loss_stats


# ---------------------------------- Demo ------------------------------------- #
if __name__ == "__main__":
    key = jax.random.PRNGKey(0)
    B, C, H, W = 2, 4, 16, 16           # heatmap classes
    K = 8                                # max objects per image
    CR = 2                               # wh / reg channels

    ks = jax.random.split(key, 8)

    # network outputs (raw conv logits / regressions), NCHW
    out_hm = jax.random.normal(ks[0], (B, C, H, W), jnp.float32)
    out_wh = jax.random.normal(ks[1], (B, CR, H, W), jnp.float32)
    out_reg = jax.random.normal(ks[2], (B, CR, H, W), jnp.float32)

    # ground-truth heatmap in [0, 1) with a few exact-1.0 peaks
    gt_hm = jax.random.uniform(ks[3], (B, C, H, W), jnp.float32, 0.0, 0.9)
    gt_hm = gt_hm.at[0, 0, 3, 5].set(1.0)
    gt_hm = gt_hm.at[0, 2, 10, 12].set(1.0)
    gt_hm = gt_hm.at[1, 1, 7, 7].set(1.0)

    # regression targets, object indices (flat H*W), and valid mask
    gt_wh = jax.random.uniform(ks[4], (B, K, CR), jnp.float32, 0.0, 8.0)
    gt_reg = jax.random.uniform(ks[5], (B, K, CR), jnp.float32, 0.0, 1.0)
    ind = jax.random.randint(ks[6], (B, K), 0, H * W, jnp.int32)
    reg_mask = (jax.random.uniform(ks[7], (B, K)) > 0.4).astype(jnp.float32)

    output = {"hm": out_hm, "wh": out_wh, "reg": out_reg}
    batch = {"hm": gt_hm, "wh": gt_wh, "reg": gt_reg,
             "ind": ind, "reg_mask": reg_mask}

    loss, stats = centernet_loss(output, batch)
    loss = jax.block_until_ready(loss)
    for v in stats.values():
        jax.block_until_ready(v)

    print("KERNEL_OK")
</pallas_src>

<mosaic_0001>
module attributes {stable_mosaic.version = 11 : i64} {
  func.func @_focal_partial_kernel(%arg0: i32, %arg1: memref<8x256xf32, #tpu.memory_space<vmem>>, %arg2: memref<8x256xf32, #tpu.memory_space<vmem>>, %arg3: memref<1x2x128xf32, #tpu.memory_space<vmem>>) attributes {dimension_semantics = [#tpu.dimension_semantics<parallel>], iteration_bounds = array<i64: 1>, scalar_prefetch = 0 : i64, scratch_operands = 0 : i64, tpu.core_type = #tpu.core_type<tc>, window_params = [{transform_indices = @transform_0, window_bounds = array<i64: 8, 256>}, {transform_indices = @transform_1, window_bounds = array<i64: 8, 256>}, {transform_indices = @transform_2, window_bounds = array<i64: 1, 2, 128>}]} {
    %c0 = arith.constant 0 : index
    %c0_0 = arith.constant 0 : index
    %0 = vector.load %arg1[%c0, %c0_0] : memref<8x256xf32, #tpu.memory_space<vmem>>, vector<8x256xf32>
    %c0_1 = arith.constant 0 : index
    %c0_2 = arith.constant 0 : index
    %1 = vector.load %arg2[%c0_1, %c0_2] : memref<8x256xf32, #tpu.memory_space<vmem>>, vector<8x256xf32>
    %c8_i32 = arith.constant 8 : i32
    %2 = arith.muli %arg0, %c8_i32 : i32
    %3 = tpu.iota {dimensions = array<i32: 0>} : vector<8x1xi32>
    %4 = vector.broadcast %2 : i32 to vector<8x1xi32>
    %5 = arith.addi %4, %3 : vector<8x1xi32>
    %c8_i32_3 = arith.constant 8 : i32
    %6 = vector.broadcast %c8_i32_3 : i32 to vector<8x1xi32>
    %7 = arith.cmpi slt, %5, %6 : vector<8x1xi32>
    %cst = arith.constant 5.000000e-01 : f32
    %8 = vector.broadcast %cst : f32 to vector<8x256xf32>
    %9 = arith.mulf %8, %0 : vector<8x256xf32>
    %10 = math.tanh %9 : vector<8x256xf32>
    %cst_4 = arith.constant 1.000000e+00 : f32
    %11 = vector.broadcast %cst_4 : f32 to vector<8x256xf32>
    %12 = arith.addf %11, %10 : vector<8x256xf32>
    %cst_5 = arith.constant 5.000000e-01 : f32
    %13 = vector.broadcast %cst_5 : f32 to vector<8x256xf32>
    %14 = arith.mulf %13, %12 : vector<8x256xf32>
    %cst_6 = arith.constant 9.99999974E-5 : f32
    %cst_7 = arith.constant 0.999899983 : f32
    %15 = vector.broadcast %cst_6 : f32 to vector<8x256xf32>
    %16 = arith.maximumf %15, %14 : vector<8x256xf32>
    %17 = vector.broadcast %cst_7 : f32 to vector<8x256xf32>
    %18 = arith.minimumf %17, %16 : vector<8x256xf32>
    %19 = math.log %18 : vector<8x256xf32>
    %20 = arith.subf %19, %0 : vector<8x256xf32>
    %cst_8 = arith.constant -9.21034049 : f32
    %cst_9 = arith.constant -1.000050e-04 : f32
    %21 = vector.broadcast %cst_8 : f32 to vector<8x256xf32>
    %22 = arith.maximumf %21, %20 : vector<8x256xf32>
    %23 = vector.broadcast %cst_9 : f32 to vector<8x256xf32>
    %24 = arith.minimumf %23, %22 : vector<8x256xf32>
    %cst_10 = arith.constant 1.000000e+00 : f32
    %25 = vector.broadcast %cst_10 : f32 to vector<8x256xf32>
    %26 = arith.subf %25, %18 : vector<8x256xf32>
    %cst_11 = arith.constant 1.000000e+00 : f32
    %27 = vector.broadcast %cst_11 : f32 to vector<8x256xf32>
    %28 = arith.subf %27, %1 : vector<8x256xf32>
    %29 = arith.mulf %28, %28 : vector<8x256xf32>
    %30 = arith.mulf %29, %29 : vector<8x256xf32>
    %cst_12 = arith.constant 1.000000e+00 : f32
    %31 = vector.broadcast %cst_12 : f32 to vector<8x256xf32>
    %32 = arith.cmpf oeq, %1, %31 : vector<8x256xf32>
    %33 = arith.mulf %26, %26 : vector<8x256xf32>
    %34 = arith.mulf %18, %18 : vector<8x256xf32>
    %35 = arith.mulf %34, %30 : vector<8x256xf32>
    %36 = arith.select %32, %33, %35 : vector<8x256xi1>, vector<8x256xf32>
    %37 = arith.select %32, %19, %24 : vector<8x256xi1>, vector<8x256xf32>
    %cst_13 = arith.constant 1.000000e+00 : f32
    %38 = vector.broadcast %cst_13 : f32 to vector<8x256xf32>
    %39 = arith.cmpf ole, %1, %38 : vector<8x256xf32>
    %40 = vector.broadcast %7 : vector<8x1xi1> to vector<8x256xi1>
    %41 = arith.andi %40, %39 : vector<8x256xi1>
    %42 = arith.mulf %36, %37 : vector<8x256xf32>
    %cst_14 = arith.constant 0.000000e+00 : f32
    %43 = vector.broadcast %cst_14 : f32 to vector<8x256xf32>
    %44 = arith.select %41, %42, %43 : vector<8x256xi1>, vector<8x256xf32>
    %45 = vector.broadcast %7 : vector<8x1xi1> to vector<8x256xi1>
    %46 = arith.andi %45, %32 : vector<8x256xi1>
    %cst_15 = arith.constant 1.000000e+00 : f32
    %cst_16 = arith.constant 0.000000e+00 : f32
    %47 = vector.broadcast %cst_15 : f32 to vector<8x256xf32>
    %48 = vector.broadcast %cst_16 : f32 to vector<8x256xf32>
    %49 = arith.select %46, %47, %48 : vector<8x256xi1>, vector<8x256xf32>
    %50 = vector.shape_cast %44 : vector<8x256xf32> to vector<1x8x256xf32>
    %cst_17 = arith.constant dense<0.000000e+00> : vector<1xf32>
    %51 = vector.multi_reduction <add>, %50, %cst_17 [1, 2] : vector<1x8x256xf32> to vector<1xf32>
    %52 = vector.shape_cast %51 : vector<1xf32> to vector<1x1x1xf32>
    %53 = vector.extract %52[0, 0, 0] : f32 from vector<1x1x1xf32>
    %54 = vector.broadcast %53 : f32 to vector<128xf32>
    %c0_18 = arith.constant 0 : index
    %c0_19 = arith.constant 0 : index
    %c0_20 = arith.constant 0 : index
    %55 = vector.load %arg3[%c0_18, %c0_19, %c0_20] : memref<1x2x128xf32, #tpu.memory_space<vmem>>, vector<1x1x128xf32>
    %56 = vector.shape_cast %55 : vector<1x1x128xf32> to vector<128xf32>
    %57 = vector.shape_cast %54 : vector<128xf32> to vector<1x1x128xf32>
    tpu.vector_store %arg3[%c0_18, %c0_19, %c0_20], %57 {strides = array<i32>} : memref<1x2x128xf32, #tpu.memory_space<vmem>>, vector<1x1x128xf32>,
    %58 = vector.shape_cast %49 : vector<8x256xf32> to vector<1x8x256xf32>
    %cst_21 = arith.constant dense<0.000000e+00> : vector<1xf32>
    %59 = vector.multi_reduction <add>, %58, %cst_21 [1, 2] : vector<1x8x256xf32> to vector<1xf32>
    %60 = vector.shape_cast %59 : vector<1xf32> to vector<1x1x1xf32>
    %61 = vector.extract %60[0, 0, 0] : f32 from vector<1x1x1xf32>
    %62 = vector.broadcast %61 : f32 to vector<128xf32>
    %c0_22 = arith.constant 0 : index
    %c1 = arith.constant 1 : index
    %c0_23 = arith.constant 0 : index
    %63 = vector.load %arg3[%c0_22, %c1, %c0_23] : memref<1x2x128xf32, #tpu.memory_space<vmem>>, vector<1x1x128xf32>
    %64 = vector.shape_cast %63 : vector<1x1x128xf32> to vector<128xf32>
    %65 = vector.shape_cast %62 : vector<128xf32> to vector<1x1x128xf32>
    tpu.vector_store %arg3[%c0_22, %c1, %c0_23], %65 {strides = array<i32>} : memref<1x2x128xf32, #tpu.memory_space<vmem>>, vector<1x1x128xf32>,
    return
  }
  func.func @transform_0(%arg0: i32) -> (i32, i32) {
    %c0_i32 = arith.constant 0 : i32
    %c0_i32_0 = arith.constant 0 : i32
    return %arg0, %c0_i32 : i32, i32
  }
  func.func @transform_1(%arg0: i32) -> (i32, i32) {
    %c0_i32 = arith.constant 0 : i32
    %c0_i32_0 = arith.constant 0 : i32
    return %arg0, %c0_i32 : i32, i32
  }
  func.func @transform_2(%arg0: i32) -> (i32, i32, i32) {
    %c0_i32 = arith.constant 0 : i32
    %c0_i32_0 = arith.constant 0 : i32
    %c0_i32_1 = arith.constant 0 : i32
    return %arg0, %c0_i32, %c0_i32_0 : i32, i32, i32
  }
}

</mosaic_0001>

<bundles_post_ra>
// kernel: tpu_custom_call.1
= control target key start
LH: loop header
LB: loop body
LE: loop exit
PB: predicated region body
PF: predicated region fallthrough
CT: control target
= control target key end

     0   :  { %7 = vsyncpa [#allocation3], 0  ;;  %s276_s0 = inlined_call_operand.hbm [shape: f32[8,256], index: 0, kind: input, shape index: {}]   ;;  %s277_s1 = inlined_call_operand.hbm [shape: f32[8,256], index: 1, kind: input, shape index: {}]   ;;  %s278_s2 = inlined_call_operand.hbm [shape: f32[1,2,128], index: 2, kind: output, shape index: {}]  }
   0x1   :  { %8 = vsyncpa [#allocation6], 0 }
   0x2   :  { %9 = vsyncpa [#allocation4], 0  ;;  %s15_s11 = sshll.u32 %s276_s0, 4  ;;  %s242_s12 = smov [#allocation2]   ;;  %s16_s11 = int_to_ptr.hbm [resolvable:$true] %s15_s11 }
   0x3   :  { %s17_s13 = sshll.u32 %s242_s12, 4  ;;  %s26_s16 = sshll.u32 %s277_s1, 4  ;;  %s18_s13 = int_to_ptr.vmem [resolvable:$true] %s17_s13  ;;  %s27_s16 = int_to_ptr.hbm [resolvable:$true] %s26_s16 }
   0x4   :  { %20 = dma.hbm_to_vmem [thread:$0]  %s16_s11, 256, %s18_s13, [#allocation3]  }
   0x5   :  { %s243_s17 = smov [#allocation5]  }
   0x6   :  { %s28_s18 = sshll.u32 %s243_s17, 4  ;;  %s29_s18 = int_to_ptr.vmem [resolvable:$true] %s28_s18 }
   0x7   :  { %31 = dma.hbm_to_vmem [thread:$0]  %s27_s16, 256, %s29_s18, [#allocation6]  }
   0x8   :  { %236 = dma.done.wait [#allocation3], 256  }
   0x9   :  { %237 = vsyncadd [#allocation3], 4294967040 }
   0xa   :  { %238 = dma.done.wait [#allocation6], 256  }
   0xb   :  { %239 = vsyncadd [#allocation6], 4294967040  ;;  %v40_v0 = vld [vmem:[#allocation2] sm:$0xff]  ;;  %v41_v1 = vld [vmem:[#allocation2 + $0x8] sm:$0xff]  ;;  %v244_v49 = vmov 0.0   ;;  %s245_s1 = smov [#allocation7]  }
   0xc   :  { %v50_v2 = vmul.f32 0.5, %v40_v0  ;;  %v51_v3 = vmul.f32 0.5, %v41_v1  ;;  %v42_v8 = vld [vmem:[#allocation5] sm:$0xff]  ;;  %v43_v10 = vld [vmem:[#allocation5 + $0x8] sm:$0xff]  ;;  %s135_s19 = sshll.u32 %s245_s1, 4  ;;  %s137_s22 = sshll.u32 %s278_s2, 4  ;;  %s136_s19 = int_to_ptr.vmem [resolvable:$true] %s135_s19  ;;  %s138_s22 = int_to_ptr.hbm [resolvable:$true] %s137_s22 }
   0xd   :  { %v74_v14 = vsub.f32 1.0, %v42_v8  ;;  %v75_v16 = vsub.f32 1.0, %v43_v10  ;;  %vm80_vm0 = vcmp.eq.f32.partialorder %v42_v8, 1.0  ;;  %vm81_vm1 = vcmp.eq.f32.partialorder %v43_v10, 1.0 }
   0xe   :  { %156 = vtanh.f32 %v50_v2  ;;  %vm92_vm2 = vcmp.le.f32.partialorder %v42_v8, 1.0  ;;  %vm93_vm3 = vcmp.le.f32.partialorder %v43_v10, 1.0  ;;  %v104_v50 = vsel %vm80_vm0, 1.0, %v244_v49 }
   0xf   :  { %158 = vtanh.f32 %v51_v3  ;;  %v76_v18 = vmul.f32 %v74_v14, %v74_v14  ;;  %v77_v19 = vmul.f32 %v75_v16, %v75_v16  ;;  %v105_v51 = vsel %vm81_vm1, 1.0, %v244_v49 }
  0x10   :  { %v118_v52 = vadd.f32 %v105_v51, %v104_v50 }
  0x11   :  { %v78_v21 = vmul.f32 %v76_v18, %v76_v18  ;;  %v79_v25 = vmul.f32 %v77_v19, %v77_v19 }
  0x14   :  { %v157_v4 = vpop.eup %156 }
  0x15   :  { %v159_v5 = vpop.eup %158  ;;  %v54_v6 = vadd.f32 1.0, %v157_v4 }
  0x16   :  { %v55_v7 = vadd.f32 1.0, %v159_v5 }
  0x17   :  { %v56_v9 = vmul.f32 0.5, %v54_v6 }
  0x18   :  { %v57_v11 = vmul.f32 0.5, %v55_v7 }
  0x19   :  { %v58_v12 = vmax.f32 %v56_v9, 0.0001 }
  0x1a   :  { %v59_v13 = vmax.f32 %v57_v11, 0.0001 }
  0x1b   :  { %v60_v15 = vmin.f32 %v58_v12, 0.9999 }
  0x1c   :  { %v61_v17 = vmin.f32 %v59_v13, 0.9999 }
  0x1d   :  { %160 = vlog2.f32 %v60_v15  ;;  %v72_v20 = vsub.f32 1.0, %v60_v15  ;;  %v84_v22 = vmul.f32 %v60_v15, %v60_v15 }
  0x1e   :  { %162 = vlog2.f32 %v61_v17  ;;  %v73_v24 = vsub.f32 1.0, %v61_v17  ;;  %v85_v26 = vmul.f32 %v61_v17, %v61_v17 }
  0x1f   :  { %v82_v31 = vmul.f32 %v72_v20, %v72_v20  ;;  %v86_v32 = vmul.f32 %v84_v22, %v78_v21 }
  0x20   :  { %v83_v34 = vmul.f32 %v73_v24, %v73_v24  ;;  %v87_v35 = vmul.f32 %v85_v26, %v79_v25 }
  0x21   :  { %v88_v39 = vsel %vm80_vm0, %v82_v31, %v86_v32 }
  0x22   :  { %v89_v41 = vsel %vm81_vm1, %v83_v34, %v87_v35 }
  0x23   :  { %v161_v23 = vpop.eup %160 }
  0x24   :  { %v163_v27 = vpop.eup %162  ;;  %v63_v28 = vmul.f32 0.6931472, %v161_v23 }
  0x25   :  { %v65_v29 = vmul.f32 0.6931472, %v163_v27 }
  0x26   :  { %v66_v30 = vsub.f32 %v63_v28, %v40_v0 }
  0x27   :  { %v67_v33 = vsub.f32 %v65_v29, %v41_v1 }
  0x28   :  { %v68_v36 = vmax.f32 %v66_v30, -9.2103405 }
  0x29   :  { %v69_v37 = vmax.f32 %v67_v33, -9.2103405 }
  0x2a   :  { %v70_v38 = vmin.f32 %v68_v36, -0.000100005 }
  0x2b   :  { %v71_v40 = vmin.f32 %v69_v37, -0.000100005 }
  0x2c   :  { %v90_v42 = vsel %vm80_vm0, %v63_v28, %v70_v38 }
  0x2d   :  { %v91_v43 = vsel %vm81_vm1, %v65_v29, %v71_v40  ;;  %v98_v44 = vmul.f32 %v90_v42, %v88_v39 }
  0x2e   :  { %v99_v45 = vmul.f32 %v91_v43, %v89_v41 }
  0x2f   :  { %v100_v46 = vsel %vm92_vm2, %v98_v44, 0.0 }
  0x30   :  { %v101_v47 = vsel %vm93_vm3, %v99_v45, 0.0 }
  0x31   :  { %v106_v48 = vadd.f32 %v101_v47, %v100_v46 }
  0x33   :  { %107 = vadd.xlane.f32.xlu0 %v106_v48 }
  0x3b   :  { %119 = vadd.xlane.f32.xlu0 %v118_v52 }
  0xa6   :  { %v108_v53 = vpop.xlane.xlu0 %107 }
  0xa7   :  { %v109_v54 = vrot.slane %v108_v53, 4 }
  0xa9   :  { %v110_v55 = vadd.f32 %v109_v54, %v108_v53 }
  0xab   :  { %v111_v56 = vrot.slane %v110_v55, 2 }
  0xad   :  { %v112_v57 = vadd.f32 %v111_v56, %v110_v55 }
  0xae   :  { %v120_v58 = vpop.xlane.xlu0 %119 }
  0xaf   :  { %v121_v59 = vrot.slane %v120_v58, 4  ;;  %v113_v60 = vrot.slane %v112_v57, 1 }
  0xb1   :  { %v122_v61 = vadd.f32 %v121_v59, %v120_v58  ;;  %v114_v62 = vadd.f32 %v113_v60, %v112_v57 }
  0xb3   :  { %v123_v63 = vrot.slane %v122_v61, 2  ;;  %148 = vpush %v114_v62 }
  0xb5   :  { %v124_v0 = vadd.f32 %v123_v63, %v122_v61 }
  0xb7   :  { %v125_v1 = vrot.slane %v124_v0, 1 }
  0xb9   :  { %v126_v2 = vadd.f32 %v125_v1, %v124_v0 }
  0xbb   :  { %150 = vpush %v126_v2 }
  0xe4   :  { %s149_s0 = spop %148 }
  0xe5   :  { %v116_v3 = vstv %s149_s0 }
  0xe6   :  { %117 = vst [vmem:[#allocation7] sm:$0x1] %v116_v3 }
  0xec   :  { %s151_s23 = spop %150 }
  0xed   :  { %v128_v4 = vstv %s151_s23 }
  0xee   :  { %129 = vst [vmem:[#allocation7 + $0x1] sm:$0x1] %v128_v4 }
  0xef   :  { %140 = dma.vmem_to_hbm [thread:$0]  %s136_s19, 32, %s138_s22, [#allocation4]  }
  0xf0   :  { %240 = dma.done.wait [#allocation4], 32  }
  0xf1   :  { %241 = vsyncadd [#allocation4], 4294967264 }
  0xf2   :  { %145 = vsyncpa [#allocation3], 1 }
  0xf3   :  { %146 = vsyncpa [#allocation6], 1 }
  0xf4   :  { %147 = vsyncpa [#allocation4], 1 }

</bundles_post_ra>
